<compile_context>
chip_gen: v5e
topology: v5e:2x2
jax: 0.10.0
libtpu: 0.0.40
codegen_flags: <defaults>
</compile_context>

<pallas_src>
import functools

import jax
import jax.numpy as jnp
from jax import lax
from jax.experimental import pallas as pl
from jax.experimental.pallas import tpu as pltpu


# ----------------------------------------------------------------------------
# VMEM budget & tiling helpers (all trace-time Python).
# ----------------------------------------------------------------------------

def _vmem_limit_bytes():
    """Generation-aware scoped-VMEM limit (~75% of physical per-core VMEM)."""
    cap = 64 * 1024 * 1024            # conservative default: v7x per-TC VMEM
    try:
        info_fn = getattr(pltpu, "get_tpu_info", None)
        if info_fn is not None:
            cap = int(getattr(info_fn(), "vmem_capacity_bytes", cap)) or cap
    except Exception:                 # non-TPU backend / older jax: keep default
        pass
    return max(32 * 1024 * 1024, (cap * 3) // 4)


def _pick_tile(dim, unit, target):
    """Largest multiple of `unit` dividing `dim`, capped at `target`;
    falls back to the full dim when `dim` is not a multiple of `unit`."""
    if dim % unit != 0:
        return dim
    best = unit
    cap = min(dim, max(target, unit))
    for cand in range(unit, cap + 1, unit):
        if dim % cand == 0:
            best = cand
    return best


def _largest_divisor_leq(n, cap):
    cap = max(1, min(n, cap))
    for d in range(cap, 0, -1):
        if n % d == 0:
            return d
    return 1


def _choose_tiles(N, C, HW, itemsize, block_budget):
    """Pick (tn, tc, thw) so one x block is ~block_budget bytes."""
    itemsize = max(int(itemsize), 1)
    # dtype-aware sublane packing: 8 for f32, 16 for bf16, 32 for int8/fp8.
    unit = max(8, 32 // itemsize)
    # Spatial tile: multiple of 128 (lane dim) or the full extent.
    thw = _pick_tile(HW, 128,
                     min(HW, max(128, block_budget // (itemsize * unit))))
    # Channel tile: multiple of `unit` dividing C (or all of C); prefer >= 2
    # channel tiles so the stats pass can use both v7x TensorCores.
    tc_budget = max(unit, block_budget // (itemsize * thw))
    tc_cap = C // 2 if (C % unit == 0 and C >= 2 * unit) else C
    tc = _pick_tile(C, unit, min(256, tc_cap, tc_budget))
    # Batch tile: grow the block towards the budget when HW / C are small.
    slab = max(tc * thw * itemsize, 1)
    tn = _largest_divisor_leq(N, max(1, block_budget // slab))
    return tn, tc, thw


# ----------------------------------------------------------------------------
# Kernels
# ----------------------------------------------------------------------------

def _stats_kernel(x_ref, mean_ref, var_ref, acc_sum, acc_sq, *, count):
    """Per-channel sum / sum-of-squares, accumulated in (tc,1) f32 scratch."""
    n = pl.program_id(1)
    l = pl.program_id(2)

    @pl.when(jnp.logical_and(n == 0, l == 0))
    def _init():
        acc_sum[...] = jnp.zeros_like(acc_sum)
        acc_sq[...] = jnp.zeros_like(acc_sq)

    x = x_ref[...].astype(jnp.float32)                       # (tn, tc, thw)
    acc_sum[...] += jnp.sum(jnp.sum(x, axis=0), axis=1, keepdims=True)
    acc_sq[...] += jnp.sum(jnp.sum(x * x, axis=0), axis=1, keepdims=True)

    last = jnp.logical_and(n == pl.num_programs(1) - 1,
                           l == pl.num_programs(2) - 1)

    @pl.when(last)
    def _finalize():
        inv = jnp.float32(1.0 / count)
        mean = acc_sum[...] * inv
        var = jnp.maximum(acc_sq[...] * inv - mean * mean, 0.0)
        mean_ref[...] = mean
        var_ref[...] = var


def _norm_kernel(x_ref, mean_ref, var_ref, gamma_ref, beta_ref, o_ref, *, eps):
    """y = (x - mean) * gamma * rsqrt(var + eps) + beta, streamed."""
    x = x_ref[...].astype(jnp.float32)                       # (tn, tc, thw)
    var = var_ref[...].astype(jnp.float32)                   # (tc, 1)
    mean = mean_ref[...].astype(jnp.float32)
    # rsqrt on the EUP; per-step recompute on (tc,1) is free vs the DMA stream.
    scale = gamma_ref[...].astype(jnp.float32) * lax.rsqrt(var + jnp.float32(eps))
    shift = beta_ref[...].astype(jnp.float32) - mean * scale
    o_ref[...] = (x * scale + shift).astype(o_ref.dtype)     # 2 VPU ops/elem


def _fused_kernel(x_ref, gamma_ref, beta_ref, y_ref, mean_ref, var_ref, *, eps):
    """Single-pass BN when the whole activation fits in VMEM (2x|x| traffic)."""
    x = x_ref[...].astype(jnp.float32)                       # (N, C, HW)
    inv = jnp.float32(1.0 / (x.shape[0] * x.shape[2]))
    mean = jnp.sum(jnp.sum(x, axis=0), axis=1, keepdims=True) * inv   # (C,1)
    d = x - mean
    var = jnp.sum(jnp.sum(d * d, axis=0), axis=1, keepdims=True) * inv
    scale = gamma_ref[...].astype(jnp.float32) * lax.rsqrt(var + jnp.float32(eps))
    shift = beta_ref[...].astype(jnp.float32) - mean * scale
    y_ref[...] = (x * scale + shift).astype(y_ref.dtype)
    mean_ref[...] = mean
    var_ref[...] = var


# ----------------------------------------------------------------------------
# pallas_call wrappers
# ----------------------------------------------------------------------------

def _batch_stats(x3, tn, tc, thw, vmem_limit):
    N, C, HW = x3.shape
    kernel = functools.partial(_stats_kernel, count=N * HW)
    mean_c, var_c = pl.pallas_call(
        kernel,
        out_shape=(
            jax.ShapeDtypeStruct((C, 1), jnp.float32),
            jax.ShapeDtypeStruct((C, 1), jnp.float32),
        ),
        grid_spec=pltpu.PrefetchScalarGridSpec(
            num_scalar_prefetch=0,
            grid=(C // tc, N // tn, HW // thw),
            in_specs=[
                pl.BlockSpec((tn, tc, thw), lambda c, n, l: (n, c, l)),
            ],
            out_specs=[
                pl.BlockSpec((tc, 1), lambda c, n, l: (c, 0)),
                pl.BlockSpec((tc, 1), lambda c, n, l: (c, 0)),
            ],
            scratch_shapes=[
                pltpu.VMEM((tc, 1), jnp.float32),
                pltpu.VMEM((tc, 1), jnp.float32),
            ]),
        compiler_params=pltpu.CompilerParams(
            dimension_semantics=("parallel", "arbitrary", "arbitrary"),
            vmem_limit_bytes=vmem_limit),
    )(x3)
    return mean_c, var_c


def _normalize(x3, mean_c, var_c, gamma_c, beta_c, eps, tn, tc, thw, vmem_limit):
    N, C, HW = x3.shape
    kernel = functools.partial(_norm_kernel, eps=eps)
    cvec_spec = pl.BlockSpec((tc, 1), lambda c, n, l: (c, 0))
    return pl.pallas_call(
        kernel,
        out_shape=jax.ShapeDtypeStruct((N, C, HW), x3.dtype),
        grid_spec=pltpu.PrefetchScalarGridSpec(
            num_scalar_prefetch=0,
            grid=(C // tc, N // tn, HW // thw),
            in_specs=[
                pl.BlockSpec((tn, tc, thw), lambda c, n, l: (n, c, l)),
                cvec_spec, cvec_spec, cvec_spec, cvec_spec,
            ],
            out_specs=pl.BlockSpec((tn, tc, thw), lambda c, n, l: (n, c, l)),
        ),
        compiler_params=pltpu.CompilerParams(
            dimension_semantics=("parallel", "parallel", "parallel"),
            vmem_limit_bytes=vmem_limit),
    )(x3, mean_c, var_c, gamma_c, beta_c)


def _fused_bn(x3, gamma_c, beta_c, eps, vmem_limit):
    N, C, HW = x3.shape
    kernel = functools.partial(_fused_kernel, eps=eps)
    return pl.pallas_call(
        kernel,
        out_shape=(
            jax.ShapeDtypeStruct((N, C, HW), x3.dtype),
            jax.ShapeDtypeStruct((C, 1), jnp.float32),
            jax.ShapeDtypeStruct((C, 1), jnp.float32),
        ),
        grid_spec=pltpu.PrefetchScalarGridSpec(
            num_scalar_prefetch=0,
            grid=(1,),
            in_specs=[
                pl.BlockSpec((N, C, HW), lambda i: (0, 0, 0)),
                pl.BlockSpec((C, 1), lambda i: (0, 0)),
                pl.BlockSpec((C, 1), lambda i: (0, 0)),
            ],
            out_specs=[
                pl.BlockSpec((N, C, HW), lambda i: (0, 0, 0)),
                pl.BlockSpec((C, 1), lambda i: (0, 0)),
                pl.BlockSpec((C, 1), lambda i: (0, 0)),
            ]),
        compiler_params=pltpu.CompilerParams(
            dimension_semantics=("arbitrary",),
            vmem_limit_bytes=vmem_limit),
    )(x3, gamma_c, beta_c)


# ----------------------------------------------------------------------------
# Public forward functions (match the reference module's semantics)
# ----------------------------------------------------------------------------

def batch_norm2d_train(x, gamma, beta, moving_mean, moving_var,
                       eps=1e-5, momentum=0.9, force_two_pass=False):
    """x: (N, C, H, W). gamma/beta/moving_*: (1, C, 1, 1).

    Returns (y, new_moving_mean, new_moving_var) matching the reference
    BatchNorm2d.forward in training mode (biased variance,
    new = momentum*old + (1-momentum)*batch)."""
    N, C, H, W = x.shape
    HW = H * W
    x3 = x.reshape(N, C, HW)                       # free reshape, no transpose
    gamma_c = gamma.reshape(C, 1).astype(jnp.float32)
    beta_c = beta.reshape(C, 1).astype(jnp.float32)

    limit = _vmem_limit_bytes()
    x_f32_bytes = N * C * HW * 4

    if (not force_two_pass) and 8 * x_f32_bytes <= limit:
        # Whole activation fits in VMEM: single fused pass (2x|x| HBM traffic).
        y3, mean_c, var_c = _fused_bn(x3, gamma_c, beta_c, eps, limit)
    else:
        # Streaming two-pass (3x|x| HBM traffic), budget-driven tiles.
        tn, tc, thw = _choose_tiles(N, C, HW, x3.dtype.itemsize, limit // 8)
        mean_c, var_c = _batch_stats(x3, tn, tc, thw, limit)
        y3 = _normalize(x3, mean_c, var_c, gamma_c, beta_c, eps,
                        tn, tc, thw, limit)

    y = y3.reshape(N, C, H, W)
    batch_mean = mean_c.reshape(1, C, 1, 1)
    batch_var = var_c.reshape(1, C, 1, 1)

    # Running-stat momentum update (module state mutation) on (C,)-sized
    # arrays in plain JAX; off the y critical path and negligible cost.
    new_moving_mean = momentum * moving_mean + (1.0 - momentum) * batch_mean
    new_moving_var = momentum * moving_var + (1.0 - momentum) * batch_var
    return y, new_moving_mean, new_moving_var


def batch_norm2d_eval(x, gamma, beta, moving_mean, moving_var, eps=1e-5):
    """Inference-mode forward: normalize with the moving statistics."""
    N, C, H, W = x.shape
    HW = H * W
    x3 = x.reshape(N, C, HW)
    limit = _vmem_limit_bytes()
    tn, tc, thw = _choose_tiles(N, C, HW, x3.dtype.itemsize, limit // 8)
    gamma_c = gamma.reshape(C, 1).astype(jnp.float32)
    beta_c = beta.reshape(C, 1).astype(jnp.float32)
    mean_c = moving_mean.reshape(C, 1).astype(jnp.float32)
    var_c = moving_var.reshape(C, 1).astype(jnp.float32)
    y3 = _normalize(x3, mean_c, var_c, gamma_c, beta_c, eps, tn, tc, thw, limit)
    return y3.reshape(N, C, H, W)


# ----------------------------------------------------------------------------
# Self-test
# ----------------------------------------------------------------------------

if __name__ == "__main__":
    key = jax.random.PRNGKey(0)
    N, C, H, W = 2, 4, 16, 16
    x = jax.random.normal(key, (N, C, H, W), dtype=jnp.float32)

    # Deterministic parameter init matching the module's __init__.
    gamma = jnp.ones((1, C, 1, 1), jnp.float32)
    beta = jnp.ones((1, C, 1, 1), jnp.float32)
    moving_mean = jnp.zeros((1, C, 1, 1), jnp.float32)
    moving_var = jnp.zeros((1, C, 1, 1), jnp.float32)

    # Plain-JAX reference of the PyTorch forward (training mode).
    tm = jnp.mean(x, axis=(0, 2, 3), keepdims=True)
    tv = jnp.mean((x - tm) ** 2, axis=(0, 2, 3), keepdims=True)
    y_ref = gamma * ((x - tm) / jnp.sqrt(tv + 1e-5)) + beta

    # Fused single-pass path (small activation -> fits in VMEM).
    y, new_mm, new_mv = batch_norm2d_train(
        x, gamma, beta, moving_mean, moving_var, eps=1e-5, momentum=0.9)
    jax.block_until_ready((y, new_mm, new_mv))
    assert jnp.allclose(y, y_ref, atol=1e-5, rtol=1e-5)
    assert jnp.allclose(new_mm, 0.9 * moving_mean + 0.1 * tm, atol=1e-6)
    assert jnp.allclose(new_mv, 0.9 * moving_var + 0.1 * tv, atol=1e-5)

    # Two-pass streaming path (exercised explicitly on the same shape).
    y2, mm2, mv2 = batch_norm2d_train(
        x, gamma, beta, moving_mean, moving_var, eps=1e-5, momentum=0.9,
        force_two_pass=True)
    jax.block_until_ready((y2, mm2, mv2))
    assert jnp.allclose(y2, y_ref, atol=1e-5, rtol=1e-5)
    assert jnp.allclose(mm2, new_mm, atol=1e-6)
    assert jnp.allclose(mv2, new_mv, atol=1e-5)

    # Eval path (moving-stat normalization).
    y_eval = batch_norm2d_eval(x, gamma, beta, new_mm, new_mv, eps=1e-5)
    jax.block_until_ready(y_eval)
    y_eval_ref = gamma * ((x - new_mm) / jnp.sqrt(new_mv + 1e-5)) + beta
    assert jnp.allclose(y_eval, y_eval_ref, atol=1e-4, rtol=1e-4)

    print("KERNEL_OK")
</pallas_src>

<mosaic_0001>
module attributes {stable_mosaic.version = 11 : i64} {
  func.func @_fused_kernel(%arg0: i32, %arg1: memref<2x4x256xf32, #tpu.memory_space<vmem>>, %arg2: memref<4x1xf32, #tpu.memory_space<vmem>>, %arg3: memref<4x1xf32, #tpu.memory_space<vmem>>, %arg4: memref<2x4x256xf32, #tpu.memory_space<vmem>>, %arg5: memref<4x1xf32, #tpu.memory_space<vmem>>, %arg6: memref<4x1xf32, #tpu.memory_space<vmem>>) attributes {dimension_semantics = [#tpu.dimension_semantics<arbitrary>], iteration_bounds = array<i64: 1>, scalar_prefetch = 0 : i64, scratch_operands = 0 : i64, tpu.core_type = #tpu.core_type<tc>, window_params = [{pipeline_mode = #tpu.pipeline_mode<synchronous>, transform_indices = @transform_0, window_bounds = array<i64: 2, 4, 256>}, {pipeline_mode = #tpu.pipeline_mode<synchronous>, transform_indices = @transform_1, window_bounds = array<i64: 4, 1>}, {pipeline_mode = #tpu.pipeline_mode<synchronous>, transform_indices = @transform_2, window_bounds = array<i64: 4, 1>}, {pipeline_mode = #tpu.pipeline_mode<synchronous>, transform_indices = @transform_3, window_bounds = array<i64: 2, 4, 256>}, {pipeline_mode = #tpu.pipeline_mode<synchronous>, transform_indices = @transform_4, window_bounds = array<i64: 4, 1>}, {pipeline_mode = #tpu.pipeline_mode<synchronous>, transform_indices = @transform_5, window_bounds = array<i64: 4, 1>}]} {
    %c0 = arith.constant 0 : index
    %c0_0 = arith.constant 0 : index
    %c0_1 = arith.constant 0 : index
    %0 = vector.load %arg1[%c0, %c0_0, %c0_1] : memref<2x4x256xf32, #tpu.memory_space<vmem>>, vector<2x4x256xf32>
    %cst = arith.constant dense<0.000000e+00> : vector<4x256xf32>
    %1 = vector.multi_reduction <add>, %0, %cst [0] : vector<2x4x256xf32> to vector<4x256xf32>
    %cst_2 = arith.constant dense<0.000000e+00> : vector<4xf32>
    %2 = vector.multi_reduction <add>, %1, %cst_2 [1] : vector<4x256xf32> to vector<4xf32>
    %3 = vector.shape_cast %2 : vector<4xf32> to vector<4x1xf32>
    %cst_3 = arith.constant 0.001953125 : f32
    %4 = vector.broadcast %cst_3 : f32 to vector<4x1xf32>
    %5 = arith.mulf %3, %4 : vector<4x1xf32>
    %6 = vector.shape_cast %5 : vector<4x1xf32> to vector<1x4x1xf32>
    %7 = vector.broadcast %6 : vector<1x4x1xf32> to vector<2x4x256xf32>
    %8 = arith.subf %0, %7 : vector<2x4x256xf32>
    %9 = arith.mulf %8, %8 : vector<2x4x256xf32>
    %cst_4 = arith.constant dense<0.000000e+00> : vector<4x256xf32>
    %10 = vector.multi_reduction <add>, %9, %cst_4 [0] : vector<2x4x256xf32> to vector<4x256xf32>
    %cst_5 = arith.constant dense<0.000000e+00> : vector<4xf32>
    %11 = vector.multi_reduction <add>, %10, %cst_5 [1] : vector<4x256xf32> to vector<4xf32>
    %12 = vector.shape_cast %11 : vector<4xf32> to vector<4x1xf32>
    %cst_6 = arith.constant 0.001953125 : f32
    %13 = vector.broadcast %cst_6 : f32 to vector<4x1xf32>
    %14 = arith.mulf %12, %13 : vector<4x1xf32>
    %c0_7 = arith.constant 0 : index
    %c0_8 = arith.constant 0 : index
    %15 = vector.load %arg2[%c0_7, %c0_8] : memref<4x1xf32, #tpu.memory_space<vmem>>, vector<4x1xf32>
    %cst_9 = arith.constant 9.99999974E-6 : f32
    %16 = vector.broadcast %cst_9 : f32 to vector<4x1xf32>
    %17 = arith.addf %14, %16 : vector<4x1xf32>
    %18 = math.rsqrt %17 : vector<4x1xf32>
    %19 = arith.mulf %15, %18 : vector<4x1xf32>
    %c0_10 = arith.constant 0 : index
    %c0_11 = arith.constant 0 : index
    %20 = vector.load %arg3[%c0_10, %c0_11] : memref<4x1xf32, #tpu.memory_space<vmem>>, vector<4x1xf32>
    %21 = arith.mulf %5, %19 : vector<4x1xf32>
    %22 = arith.subf %20, %21 : vector<4x1xf32>
    %23 = vector.shape_cast %19 : vector<4x1xf32> to vector<1x4x1xf32>
    %24 = vector.broadcast %23 : vector<1x4x1xf32> to vector<2x4x256xf32>
    %25 = arith.mulf %0, %24 : vector<2x4x256xf32>
    %26 = vector.shape_cast %22 : vector<4x1xf32> to vector<1x4x1xf32>
    %27 = vector.broadcast %26 : vector<1x4x1xf32> to vector<2x4x256xf32>
    %28 = arith.addf %25, %27 : vector<2x4x256xf32>
    %c0_12 = arith.constant 0 : index
    %c0_13 = arith.constant 0 : index
    %c0_14 = arith.constant 0 : index
    %29 = vector.load %arg4[%c0_12, %c0_13, %c0_14] : memref<2x4x256xf32, #tpu.memory_space<vmem>>, vector<2x4x256xf32>
    tpu.vector_store %arg4[%c0_12, %c0_13, %c0_14], %28 {strides = array<i32>} : memref<2x4x256xf32, #tpu.memory_space<vmem>>, vector<2x4x256xf32>,
    %c0_15 = arith.constant 0 : index
    %c0_16 = arith.constant 0 : index
    %30 = vector.load %arg5[%c0_15, %c0_16] : memref<4x1xf32, #tpu.memory_space<vmem>>, vector<4x1xf32>
    tpu.vector_store %arg5[%c0_15, %c0_16], %5 {strides = array<i32>} : memref<4x1xf32, #tpu.memory_space<vmem>>, vector<4x1xf32>,
    %c0_17 = arith.constant 0 : index
    %c0_18 = arith.constant 0 : index
    %31 = vector.load %arg6[%c0_17, %c0_18] : memref<4x1xf32, #tpu.memory_space<vmem>>, vector<4x1xf32>
    tpu.vector_store %arg6[%c0_17, %c0_18], %14 {strides = array<i32>} : memref<4x1xf32, #tpu.memory_space<vmem>>, vector<4x1xf32>,
    return
  }
  func.func @transform_0(%arg0: i32) -> (i32, i32, i32) {
    %c0_i32 = arith.constant 0 : i32
    %c0_i32_0 = arith.constant 0 : i32
    %c0_i32_1 = arith.constant 0 : i32
    %c0_i32_2 = arith.constant 0 : i32
    return %c0_i32, %c0_i32_0, %c0_i32_1 : i32, i32, i32
  }
  func.func @transform_1(%arg0: i32) -> (i32, i32) {
    %c0_i32 = arith.constant 0 : i32
    %c0_i32_0 = arith.constant 0 : i32
    %c0_i32_1 = arith.constant 0 : i32
    return %c0_i32, %c0_i32_0 : i32, i32
  }
  func.func @transform_2(%arg0: i32) -> (i32, i32) {
    %c0_i32 = arith.constant 0 : i32
    %c0_i32_0 = arith.constant 0 : i32
    %c0_i32_1 = arith.constant 0 : i32
    return %c0_i32, %c0_i32_0 : i32, i32
  }
  func.func @transform_3(%arg0: i32) -> (i32, i32, i32) {
    %c0_i32 = arith.constant 0 : i32
    %c0_i32_0 = arith.constant 0 : i32
    %c0_i32_1 = arith.constant 0 : i32
    %c0_i32_2 = arith.constant 0 : i32
    return %c0_i32, %c0_i32_0, %c0_i32_1 : i32, i32, i32
  }
  func.func @transform_4(%arg0: i32) -> (i32, i32) {
    %c0_i32 = arith.constant 0 : i32
    %c0_i32_0 = arith.constant 0 : i32
    %c0_i32_1 = arith.constant 0 : i32
    return %c0_i32, %c0_i32_0 : i32, i32
  }
  func.func @transform_5(%arg0: i32) -> (i32, i32) {
    %c0_i32 = arith.constant 0 : i32
    %c0_i32_0 = arith.constant 0 : i32
    %c0_i32_1 = arith.constant 0 : i32
    return %c0_i32, %c0_i32_0 : i32, i32
  }
}

</mosaic_0001>

<bundles_post_ra>
// kernel: tpu_custom_call.1
= control target key start
LH: loop header
LB: loop body
LE: loop exit
PB: predicated region body
PF: predicated region fallthrough
CT: control target
= control target key end

     0   :  { %11 = vsyncpa [#allocation3], 0  ;;  %s313_s0 = inlined_call_operand.hbm [shape: f32[2,4,256], index: 0, kind: input, shape index: {}]   ;;  %s314_s1 = inlined_call_operand.vmem [shape: f32[4,1], index: 1, kind: input, shape index: {}]   ;;  %s315_s2 = inlined_call_operand.vmem [shape: f32[4,1], index: 2, kind: input, shape index: {}]   ;;  %s316_s3 = inlined_call_operand.hbm [shape: f32[2,4,256], index: 3, kind: output, shape index: {0}]   ;;  %s317_s4 = inlined_call_operand.vmem [shape: f32[4,1], index: 4, kind: output, shape index: {1}]   ;;  %s318_s5 = inlined_call_operand.vmem [shape: f32[4,1], index: 5, kind: output, shape index: {2}]  }
   0x1   :  { %12 = vsyncpa [#allocation4], 0  ;;  %s17_s20 = sshll.u32 %s313_s0, 4  ;;  %s229_s21 = smov [#allocation2]   ;;  %s18_s20 = int_to_ptr.hbm [resolvable:$true] %s17_s20 }
   0x2   :  { %s19_s22 = sshll.u32 %s229_s21, 4  ;;  %s230_s23 = smov 128   ;;  %s20_s22 = int_to_ptr.vmem [resolvable:$true] %s19_s22 }
   0x3   :  { %s231_s24 = smov 8  }
   0x4   :  { %25 = dma.hbm_to_vmem [thread:$0]  %s18_s20, 256, %s20_s22, [#allocation3], %s230_s23, %s230_s23, %s231_s24  }
   0x5   :  { %225 = dma.done.wait [#allocation3], 256  }
   0x6   :  { %226 = vsyncadd [#allocation3], 4294967040  ;;  %v271_v0 = vld [vmem:[#allocation2] sm:$0xff]  ;;  %v273_v1 = vld [vmem:[#allocation2 + $0x8] sm:$0xff]  ;;  %vm49_vm0 = vcmask 1043456   ;;  %vm137_vm1 = vcmask 3072  }
   0x7   :  { %38 = vst [vmem:[#allocation1] ss:$2 sm:$0xff] %v271_v0  ;;  %v232_v15 = vmov 839922192   ;;  %v233_v38 = vmov 0   ;;  %s146_s8 = sshll.u32 %s316_s3, 4  ;;  %s147_s8 = int_to_ptr.hbm [resolvable:$true] %s146_s8 }
   0x8   :  { %42 = vst [vmem:[#allocation1 + $0x10] ss:$2 sm:$0xff] %v273_v1  ;;  %v64_v16 = vunpack.c.l.s4 %v232_v15  ;;  %173 = vset.pattern.permute.xlu1 %v233_v38  ;;  %174 = vset.pattern.permute.xlu0 %v233_v38  ;;  %v97_v47 = vld [vmem:[%s314_s1] sm:$0xf]  ;;  %s234_s1 = smov [#allocation5]  }
   0x9   :  { %v110_v52 = vld [vmem:[%s315_s2] sm:$0xf]  ;;  %s144_s30 = sshll.u32 %s234_s1, 4  ;;  %s145_s30 = int_to_ptr.vmem [resolvable:$true] %s144_s30 }
   0xa   :  { %v65_v17 = vunpack.c.0.s8 %v64_v16 }
   0xe   :  { %v39_v2 = vld.sshfl [vmem:[#allocation1] sm:$0xff pattern:$0x75316420]  ;;  %v40_v3 = vld.sshfl [vmem:[#allocation1 + $0x8] sm:$0xff pattern:$0x75316420] }
   0xf   :  { %v43_v4 = vld.sshfl [vmem:[#allocation1 + $0x10] sm:$0xff pattern:$0x75316420]  ;;  %v44_v5 = vld.sshfl [vmem:[#allocation1 + $0x18] sm:$0xff pattern:$0x75316420] }
  0x10   :  { %v50_v6 = vsel %vm49_vm0, %v39_v2, 0.0  ;;  %v51_v7 = vsel %vm49_vm0, %v43_v4, 0.0  ;;  %v53_v8 = vsel %vm49_vm0, %v40_v3, 0.0  ;;  %v54_v9 = vsel %vm49_vm0, %v44_v5, 0.0 }
  0x11   :  { %v52_v10 = vadd.f32 %v51_v7, %v50_v6  ;;  %v55_v11 = vadd.f32 %v54_v9, %v53_v8 }
  0x13   :  { %v56_v12 = vsel %vm49_vm0, %v52_v10, 0.0  ;;  %v57_v13 = vsel %vm49_vm0, %v55_v11, 0.0 }
  0x14   :  { %v58_v14 = vadd.f32 %v57_v13, %v56_v12 }
  0x16   :  { %59 = vadd.xlane.f32.xlu0 %v58_v14 }
  0x89   :  { %v60_v18 = vpop.xlane.xlu0 %59 }
  0x8a   :  { %v61_v19 = vmul.f32 0.001953125, %v60_v18 }
  0x8c   :  { %v66_v20 = vperm.slane %v61_v19, %v65_v17  ;;  %138 = vst.msk [vmem:[%s317_s4] sm:$0xf] %vm137_vm1, %v61_v19 }
  0x8e   :  { %v68_v21 = vsub.f32 %v271_v0, %v66_v20  ;;  %v69_v22 = vsub.f32 %v273_v1, %v66_v20 }
  0x90   :  { %v70_v23 = vmul.f32 %v68_v21, %v68_v21  ;;  %v71_v24 = vmul.f32 %v69_v22, %v69_v22 }
  0x92   :  { %74 = vst [vmem:[#allocation1] ss:$2 sm:$0xff] %v70_v23 }
  0x93   :  { %78 = vst [vmem:[#allocation1 + $0x10] ss:$2 sm:$0xff] %v71_v24 }
  0x99   :  { %v75_v25 = vld.sshfl [vmem:[#allocation1] sm:$0xff pattern:$0x75316420]  ;;  %v76_v26 = vld.sshfl [vmem:[#allocation1 + $0x8] sm:$0xff pattern:$0x75316420] }
  0x9a   :  { %v79_v27 = vld.sshfl [vmem:[#allocation1 + $0x10] sm:$0xff pattern:$0x75316420]  ;;  %v80_v28 = vld.sshfl [vmem:[#allocation1 + $0x18] sm:$0xff pattern:$0x75316420] }
  0x9b   :  { %v85_v29 = vsel %vm49_vm0, %v75_v25, 0.0  ;;  %v86_v30 = vsel %vm49_vm0, %v79_v27, 0.0  ;;  %v88_v31 = vsel %vm49_vm0, %v76_v26, 0.0  ;;  %v89_v32 = vsel %vm49_vm0, %v80_v28, 0.0 }
  0x9c   :  { %v87_v33 = vadd.f32 %v86_v30, %v85_v29  ;;  %v90_v34 = vadd.f32 %v89_v32, %v88_v31 }
  0x9e   :  { %v91_v35 = vsel %vm49_vm0, %v87_v33, 0.0  ;;  %v92_v36 = vsel %vm49_vm0, %v90_v34, 0.0 }
  0x9f   :  { %v93_v37 = vadd.f32 %v92_v36, %v91_v35 }
  0xa1   :  { %94 = vadd.xlane.f32.xlu0 %v93_v37 }
 0x114   :  { %v95_v39 = vpop.xlane.xlu0 %94 }
 0x115   :  { %v96_v40 = vmul.f32 0.001953125, %v95_v39 }
 0x117   :  { %v98_v41 = vadd.f32 1e-05, %v96_v40  ;;  %139 = vst.msk [vmem:[%s318_s5] sm:$0xf] %vm137_vm1, %v96_v40 }
 0x119   :  { %175 = vrsqrt.f32 %v98_v41  ;;  %vm105_vm3 = vweird.f32 %v98_v41 }
 0x11f   :  { %v176_v42 = vpop.eup %175 }
 0x120   :  { %v100_v43 = vmul.f32 %v176_v42, %v98_v41  ;;  %vm106_vm2 = vweird.f32 %v176_v42 }
 0x121   :  { %vm107_vm4 = vmor %vm105_vm3, %vm106_vm2 }
 0x122   :  { %v101_v44 = vmul.f32 %v176_v42, %v100_v43 }
 0x124   :  { %v102_v45 = vmul.f32 0.5, %v101_v44 }
 0x126   :  { %v103_v46 = vsub.f32 1.5, %v102_v45 }
 0x128   :  { %v104_v48 = vmul.f32 %v176_v42, %v103_v46 }
 0x12a   :  { %v108_v49 = vsel %vm107_vm4, %v176_v42, %v104_v48 }
 0x12b   :  { %v109_v50 = vmul.f32 %v108_v49, %v97_v47 }
 0x12d   :  { %115 = vperm.xlu1 %173, %v109_v50   ;;  %v111_v51 = vmul.f32 %v109_v50, %v61_v19 }
 0x12f   :  { %v112_v53 = vsub.f32 %v110_v52, %v111_v51 }
 0x135   :  { %126 = vperm.xlu1 %173, %v112_v53  }
 0x19f   :  { %v116_v54 = vpop.permute.xlu1 %115 }
 0x1a0   :  { %v120_v55 = vperm.slane %v116_v54, %v65_v17 }
 0x1a2   :  { %v122_v57 = vmul.f32 %v120_v55, %v271_v0  ;;  %v123_v58 = vmul.f32 %v120_v55, %v273_v1 }
 0x1a7   :  { %v127_v56 = vpop.permute.xlu1 %126 }
 0x1a8   :  { %v131_v59 = vperm.slane %v127_v56, %v65_v17 }
 0x1aa   :  { %v133_v60 = vadd.f32 %v131_v59, %v122_v57  ;;  %v134_v61 = vadd.f32 %v131_v59, %v123_v58 }
 0x1ac   :  { %135 = vst [vmem:[#allocation5] sm:$0xff] %v133_v60 }
 0x1ad   :  { %136 = vst [vmem:[#allocation5 + $0x8] sm:$0xff] %v134_v61 }
 0x1ae   :  { %152 = dma.vmem_to_hbm [thread:$0]  %s145_s30, 256, %s147_s8, [#allocation4], %s230_s23, %s230_s23, %s231_s24  }
 0x1af   :  { %227 = dma.done.wait [#allocation4], 256  }
 0x1b0   :  { %228 = vsyncadd [#allocation4], 4294967040 }
 0x1b1   :  { %165 = vsyncpa [#allocation3], 1 }
 0x1b2   :  { %166 = vsyncpa [#allocation4], 1 }

</bundles_post_ra>
